<compile_context>
chip_gen: v5e
topology: v5e:2x2
jax: 0.10.0
libtpu: 0.0.40
codegen_flags: <defaults>
</compile_context>

<pallas_src>
import math

import jax
import jax.numpy as jnp
from jax.experimental import pallas as pl
from jax.experimental.pallas import tpu as pltpu


# ----------------------------- small helpers -----------------------------

def _unroll_factor(n):
    for u in (8, 4, 2, 1):
        if n % u == 0:
            return u
    return 1


def _row_tile(m, cap=512):
    # block rows must be a multiple of 8 or equal the full extent
    if m % 8 != 0:
        return m
    return min(cap, m)


def _lstm_from_gates(gates, c_prev, H):
    # PyTorch gate order: i, f, g, o ; gates: (B, 4H) f32
    i = jax.nn.sigmoid(gates[:, 0 * H:1 * H])
    f = jax.nn.sigmoid(gates[:, 1 * H:2 * H])
    g = jnp.tanh(gates[:, 2 * H:3 * H])
    o = jax.nn.sigmoid(gates[:, 3 * H:4 * H])
    c_new = f * c_prev + i * g
    h_new = o * jnp.tanh(c_new)
    return h_new, c_new


# ------------------- hoisted encoder input-gate projection -------------------

def _enc_gates_kernel(x_ref, wf_ref, bf_ref, wb_ref, bb_ref, gf_ref, gb_ref):
    x = x_ref[...].astype(jnp.bfloat16)
    gf_ref[...] = (jnp.dot(x, wf_ref[...], preferred_element_type=jnp.float32)
                   + bf_ref[...])
    gb_ref[...] = (jnp.dot(x, wb_ref[...], preferred_element_type=jnp.float32)
                   + bb_ref[...])


def encoder_input_gates(x2d, wf, bf, wb, bb):
    M, D = x2d.shape
    P = wf.shape[1]
    tm = _row_tile(M)
    c2 = lambda i: (0, 0)
    row = lambda i: (i, 0)
    return pl.pallas_call(
        _enc_gates_kernel,
        out_shape=(jax.ShapeDtypeStruct((M, P), jnp.float32),
                   jax.ShapeDtypeStruct((M, P), jnp.float32)),
        grid=(pl.cdiv(M, tm),),
        in_specs=[pl.BlockSpec((tm, D), row),
                  pl.BlockSpec((D, P), c2),
                  pl.BlockSpec((1, P), c2),
                  pl.BlockSpec((D, P), c2),
                  pl.BlockSpec((1, P), c2)],
        out_specs=(pl.BlockSpec((tm, P), row),
                   pl.BlockSpec((tm, P), row)),
        compiler_params=pltpu.CompilerParams(dimension_semantics=("parallel",)),
    )(x2d, wf, bf, wb, bb)


# ------------------------------ generic tiled linear ------------------------------

def _linear_kernel(x_ref, w_ref, b_ref, o_ref):
    o_ref[...] = (jnp.dot(x_ref[...].astype(jnp.bfloat16), w_ref[...],
                          preferred_element_type=jnp.float32)
                  + b_ref[...]).astype(o_ref.dtype)


def linear_tiled(x2d, w_bf16, b_f32, out_dtype=jnp.float32):
    M, K = x2d.shape
    P = w_bf16.shape[1]
    tm = _row_tile(M)
    c2 = lambda i: (0, 0)
    row = lambda i: (i, 0)
    return pl.pallas_call(
        _linear_kernel,
        out_shape=jax.ShapeDtypeStruct((M, P), out_dtype),
        grid=(pl.cdiv(M, tm),),
        in_specs=[pl.BlockSpec((tm, K), row),
                  pl.BlockSpec((K, P), c2),
                  pl.BlockSpec((1, P), c2)],
        out_specs=pl.BlockSpec((tm, P), row),
        compiler_params=pltpu.CompilerParams(dimension_semantics=("parallel",)),
    )(x2d, w_bf16, b_f32)


# ----------------------------- fused encoder recurrence -----------------------------

def _enc_kernel(gxf_ref, gxb_ref, whhf_ref, whhb_ref,
                outf_ref, outb_ref, cf_out_ref, cb_out_ref,
                hf, cf, hb, cb):
    # gxf/gxb: (U,B,4H) precomputed x-gates (fwd block t..t+U, bwd block reversed)
    # whh*: (H,4H) bf16 resident
    @pl.when(pl.program_id(0) == 0)
    def _():
        hf[...] = jnp.zeros_like(hf)
        cf[...] = jnp.zeros_like(cf)
        hb[...] = jnp.zeros_like(hb)
        cb[...] = jnp.zeros_like(cb)

    U = gxf_ref.shape[0]
    H = hf.shape[-1]

    for u in range(U):                       # static unroll
        gf = gxf_ref[u] + jnp.dot(hf[...].astype(jnp.bfloat16), whhf_ref[...],
                                  preferred_element_type=jnp.float32)
        hfn, cfn = _lstm_from_gates(gf, cf[...], H)
        hf[...] = hfn
        cf[...] = cfn
        outf_ref[u] = hfn

        ub = U - 1 - u                       # backward direction within the block
        gb = gxb_ref[ub] + jnp.dot(hb[...].astype(jnp.bfloat16), whhb_ref[...],
                                   preferred_element_type=jnp.float32)
        hbn, cbn = _lstm_from_gates(gb, cb[...], H)
        hb[...] = hbn
        cb[...] = cbn
        outb_ref[ub] = hbn

    cf_out_ref[...] = cf[...]                # resident; final step's value kept
    cb_out_ref[...] = cb[...]


def encoder_bilstm(gxf_sbg, gxb_sbg, whhf_bf16, whhb_bf16, H):
    S, B, G = gxf_sbg.shape
    U = _unroll_factor(S)
    nblk = S // U
    c2 = lambda j: (0, 0)
    return pl.pallas_call(
        _enc_kernel,
        out_shape=(jax.ShapeDtypeStruct((S, B, H), jnp.float32),   # fwd outputs
                   jax.ShapeDtypeStruct((S, B, H), jnp.float32),   # bwd outputs
                   jax.ShapeDtypeStruct((B, H), jnp.float32),      # final c fwd
                   jax.ShapeDtypeStruct((B, H), jnp.float32)),     # final c bwd
        grid=(nblk,),
        in_specs=[pl.BlockSpec((U, B, G), lambda j: (j, 0, 0)),
                  pl.BlockSpec((U, B, G), lambda j: (nblk - 1 - j, 0, 0)),
                  pl.BlockSpec((H, G), c2),
                  pl.BlockSpec((H, G), c2)],
        out_specs=(pl.BlockSpec((U, B, H), lambda j: (j, 0, 0)),
                   pl.BlockSpec((U, B, H), lambda j: (nblk - 1 - j, 0, 0)),
                   pl.BlockSpec((B, H), c2),
                   pl.BlockSpec((B, H), c2)),
        scratch_shapes=[pltpu.VMEM((B, H), jnp.float32)] * 4,
        compiler_params=pltpu.CompilerParams(dimension_semantics=("arbitrary",)),
    )(gxf_sbg, gxb_sbg, whhf_bf16, whhb_bf16)


# ------------------ folded K / V / query-key / score-bias projection ------------------

def _kvq_kernel(fo_ref, bo_ref,
                wkq_f_ref, wkq_b_ref, bkq_ref,
                wv_f_ref, wv_b_ref, bv_ref,
                wsb_f_ref, wsb_b_ref,
                kq_ref, vp_ref, sb_ref):
    # fo/bo: (TM,H) encoder fwd/bwd outputs (no concat materialized)
    fo16 = fo_ref[...].astype(jnp.bfloat16)
    bo16 = bo_ref[...].astype(jnp.bfloat16)
    kq_ref[...] = (jnp.dot(fo16, wkq_f_ref[...], preferred_element_type=jnp.float32)
                   + jnp.dot(bo16, wkq_b_ref[...], preferred_element_type=jnp.float32)
                   + bkq_ref[...]).astype(kq_ref.dtype)
    vp_ref[...] = (jnp.dot(fo16, wv_f_ref[...], preferred_element_type=jnp.float32)
                   + jnp.dot(bo16, wv_b_ref[...], preferred_element_type=jnp.float32)
                   + bv_ref[...]).astype(vp_ref.dtype)
    # score bias bq . k_proj  (N=1 reduction kept on the VPU/XLU)
    sb_ref[...] = (jnp.sum(fo_ref[...] * wsb_f_ref[...], axis=-1, keepdims=True)
                   + jnp.sum(bo_ref[...] * wsb_b_ref[...], axis=-1, keepdims=True))


def kvq_project(fo2d, bo2d, wkq_f, wkq_b, bkq, wv_f, wv_b, bv, wsb_f, wsb_b):
    M, H = fo2d.shape
    E = wkq_f.shape[1]
    tm = _row_tile(M)
    c2 = lambda i: (0, 0)
    row = lambda i: (i, 0)
    return pl.pallas_call(
        _kvq_kernel,
        out_shape=(jax.ShapeDtypeStruct((M, E), jnp.bfloat16),
                   jax.ShapeDtypeStruct((M, E), jnp.bfloat16),
                   jax.ShapeDtypeStruct((M, 1), jnp.float32)),
        grid=(pl.cdiv(M, tm),),
        in_specs=[pl.BlockSpec((tm, H), row),
                  pl.BlockSpec((tm, H), row),
                  pl.BlockSpec((H, E), c2),
                  pl.BlockSpec((H, E), c2),
                  pl.BlockSpec((1, E), c2),
                  pl.BlockSpec((H, E), c2),
                  pl.BlockSpec((H, E), c2),
                  pl.BlockSpec((1, E), c2),
                  pl.BlockSpec((1, H), c2),
                  pl.BlockSpec((1, H), c2)],
        out_specs=(pl.BlockSpec((tm, E), row),
                   pl.BlockSpec((tm, E), row),
                   pl.BlockSpec((tm, 1), row)),
        compiler_params=pltpu.CompilerParams(dimension_semantics=("parallel",)),
    )(fo2d, bo2d, wkq_f, wkq_b, bkq, wv_f, wv_b, bv, wsb_f, wsb_b)


# ----------------------------- fused decoder recurrence -----------------------------

def _dec_kernel(gx0_ref, kq_ref, vp_ref, sadd_ref, c_init_ref,
                w_ctx_ref, whh0_ref, wih1_ref, whh1_ref, b1_ref,
                out_ref,
                h0, c0, h1, c1):
    # gx0: (U,B,4E) precomputed x-gates (+ all folded biases)
    # kq/vp: (B,S,E) bf16 resident ; sadd: (B,1,S) additive score bias + pad mask
    @pl.when(pl.program_id(0) == 0)
    def _():
        ci = c_init_ref[...]
        c0[...] = ci
        c1[...] = ci
        h0[...] = jnp.zeros_like(h0)
        h1[...] = jnp.zeros_like(h1)

    U = gx0_ref.shape[0]
    B, E = c1.shape
    scale = 1.0 / math.sqrt(float(E))

    for u in range(U):                       # static unroll
        # --- single-head attention; query = previous layer-1 cell state ---
        q = c1[...].astype(jnp.bfloat16).reshape(B, 1, E)
        scores = (jnp.einsum('bqe,bse->bqs', q, kq_ref[...],
                             preferred_element_type=jnp.float32) * scale
                  + sadd_ref[...])                                       # (B,1,S)
        m = jnp.max(scores, axis=-1, keepdims=True)
        ex = jnp.exp(scores - m)
        attn = ex * pl.reciprocal(jnp.sum(ex, axis=-1, keepdims=True), approx=True)
        ctx = jnp.einsum('bqs,bse->bqe', attn.astype(jnp.bfloat16), vp_ref[...],
                         preferred_element_type=jnp.float32).reshape(B, E)

        # --- LSTM layer 0 (Wo / x / bias terms pre-folded) ---
        g0 = (gx0_ref[u]
              + jnp.dot(ctx.astype(jnp.bfloat16), w_ctx_ref[...],
                        preferred_element_type=jnp.float32)
              + jnp.dot(h0[...].astype(jnp.bfloat16), whh0_ref[...],
                        preferred_element_type=jnp.float32))
        h0n, c0n = _lstm_from_gates(g0, c0[...], E)

        # TODO(synk): inter-layer LSTM dropout (dec_dropout) is train-only; skipped.
        # --- LSTM layer 1 ---
        g1 = (jnp.dot(h0n.astype(jnp.bfloat16), wih1_ref[...],
                      preferred_element_type=jnp.float32)
              + jnp.dot(h1[...].astype(jnp.bfloat16), whh1_ref[...],
                        preferred_element_type=jnp.float32)
              + b1_ref[...])
        h1n, c1n = _lstm_from_gates(g1, c1[...], E)

        h0[...] = h0n
        c0[...] = c0n
        h1[...] = h1n
        c1[...] = c1n
        out_ref[u] = h1n


def decoder_fused(gx0_tbg, kq_bse, vp_bse, sadd_b1s, c_init,
                  w_ctx, whh0, wih1, whh1, b1):
    T, B, G4 = gx0_tbg.shape
    E = c_init.shape[-1]
    S = kq_bse.shape[1]
    U = _unroll_factor(T)
    c2 = lambda j: (0, 0)
    c3 = lambda j: (0, 0, 0)
    return pl.pallas_call(
        _dec_kernel,
        out_shape=jax.ShapeDtypeStruct((T, B, E), jnp.float32),
        grid=(T // U,),
        in_specs=[pl.BlockSpec((U, B, 4 * E), lambda j: (j, 0, 0)),   # x-gates
                  pl.BlockSpec((B, S, E), c3),                        # kq (resident, bf16)
                  pl.BlockSpec((B, S, E), c3),                        # vp (resident, bf16)
                  pl.BlockSpec((B, 1, S), c3),                        # additive score bias/mask
                  pl.BlockSpec((B, E), c2),                           # c_init
                  pl.BlockSpec((E, 4 * E), c2),                       # w_ctx (Wo folded)
                  pl.BlockSpec((E, 4 * E), c2),                       # whh0
                  pl.BlockSpec((E, 4 * E), c2),                       # wih1
                  pl.BlockSpec((E, 4 * E), c2),                       # whh1
                  pl.BlockSpec((1, 4 * E), c2)],                      # b1
        out_specs=pl.BlockSpec((U, B, E), lambda j: (j, 0, 0)),
        scratch_shapes=[pltpu.VMEM((B, E), jnp.float32)] * 4,
        compiler_params=pltpu.CompilerParams(
            dimension_semantics=("arbitrary",),
            vmem_limit_bytes=64 * 1024 * 1024),
    )(gx0_tbg, kq_bse, vp_bse, sadd_b1s, c_init, w_ctx, whh0, wih1, whh1, b1)


# --------------------------- CopyNet generator (V-tiled) ---------------------------

def _copy_logits_kernel(proj_ref, vembT_ref, madd_ref, logits_ref, m_ref, l_ref):
    # proj: (1,T,D) bf16 ; vembT: (1,D,TV) bf16 ; madd: (1,1,TV) additive mask
    @pl.when(pl.program_id(1) == 0)
    def _():
        m_ref[...] = jnp.full(m_ref.shape, -1e30, dtype=jnp.float32)
        l_ref[...] = jnp.zeros_like(l_ref)

    logits = (jnp.dot(proj_ref[0], vembT_ref[0],
                      preferred_element_type=jnp.float32) + madd_ref[0])   # (T,TV)
    logits_ref[0] = logits

    m_old = m_ref[0]                                                       # (T,1)
    m_new = jnp.maximum(m_old, jnp.max(logits, axis=-1, keepdims=True))
    l_ref[0] = (l_ref[0] * jnp.exp(m_old - m_new)
                + jnp.sum(jnp.exp(logits - m_new), axis=-1, keepdims=True))
    m_ref[0] = m_new


def copynet_logits(proj_btd, vembT_bdv, madd_b1v, tile_v):
    B, T, D = proj_btd.shape
    Vp = vembT_bdv.shape[-1]
    nv = Vp // tile_v
    return pl.pallas_call(
        _copy_logits_kernel,
        out_shape=(jax.ShapeDtypeStruct((B, T, Vp), jnp.float32),
                   jax.ShapeDtypeStruct((B, T, 1), jnp.float32),
                   jax.ShapeDtypeStruct((B, T, 1), jnp.float32)),
        grid=(B, nv),
        in_specs=[pl.BlockSpec((1, T, D), lambda b, v: (b, 0, 0)),
                  pl.BlockSpec((1, D, tile_v), lambda b, v: (b, 0, v)),
                  pl.BlockSpec((1, 1, tile_v), lambda b, v: (b, 0, v))],
        out_specs=(pl.BlockSpec((1, T, tile_v), lambda b, v: (b, 0, v)),
                   pl.BlockSpec((1, T, 1), lambda b, v: (b, 0, 0)),
                   pl.BlockSpec((1, T, 1), lambda b, v: (b, 0, 0))),
        compiler_params=pltpu.CompilerParams(
            dimension_semantics=("parallel", "arbitrary"),
            vmem_limit_bytes=64 * 1024 * 1024),
    )(proj_btd, vembT_bdv, madd_b1v)


def _copy_norm_kernel(logits_ref, m_ref, l_ref, probs_ref):
    # exact divide (feeds the log-prob loss)
    probs_ref[0] = jnp.exp(logits_ref[0] - m_ref[0]) / l_ref[0]


def copynet_normalize(logits_p, m_bt1, l_bt1, tile_v):
    B, T, Vp = logits_p.shape
    nv = Vp // tile_v
    return pl.pallas_call(
        _copy_norm_kernel,
        out_shape=jax.ShapeDtypeStruct((B, T, Vp), jnp.float32),
        grid=(B, nv),
        in_specs=[pl.BlockSpec((1, T, tile_v), lambda b, v: (b, 0, v)),
                  pl.BlockSpec((1, T, 1), lambda b, v: (b, 0, 0)),
                  pl.BlockSpec((1, T, 1), lambda b, v: (b, 0, 0))],
        out_specs=pl.BlockSpec((1, T, tile_v), lambda b, v: (b, 0, v)),
        compiler_params=pltpu.CompilerParams(
            dimension_semantics=("parallel", "parallel"),
            vmem_limit_bytes=64 * 1024 * 1024),
    )(logits_p, m_bt1, l_bt1)


# ------------------------------ model glue ------------------------------

def atlas_forward(params, inputs, targets, assert_max_len):
    (encoder_inputs, encoder_masks, decoder_inputs, decoder_masks,
     vocab, vocab_mask, antimasks) = inputs
    del antimasks                                  # unused in the reference forward

    bf16 = jnp.bfloat16
    emb = params['embedding']
    enc_emb = jnp.take(emb, encoder_inputs, axis=0).astype(jnp.float32)   # (B,S,D)
    dec_emb = jnp.take(emb, decoder_inputs, axis=0).astype(jnp.float32)   # (B,T,D)
    vocab_emb = jnp.take(emb, vocab, axis=0).astype(jnp.float32)          # (B,V,D)

    # TODO(synk): nn.Dropout(p=enc_dropout) is identity in eval mode; not applied.

    B, S, D = enc_emb.shape
    T = dec_emb.shape[1]
    H = params['enc_fwd']['whh'].shape[0]
    E = 2 * H

    # ---- Encoder: hoisted input-gate projection (x read once), then recurrence ----
    x_sbd = jnp.transpose(enc_emb, (1, 0, 2))                             # (S,B,D)
    gxf_flat, gxb_flat = encoder_input_gates(
        x_sbd.reshape(S * B, D),
        params['enc_fwd']['wih'].astype(bf16), params['enc_fwd']['b'],
        params['enc_bwd']['wih'].astype(bf16), params['enc_bwd']['b'])
    gxf = gxf_flat.reshape(S, B, 4 * H)
    gxb = gxb_flat.reshape(S, B, 4 * H)

    out_f, out_b, cf, cb = encoder_bilstm(
        gxf, gxb,
        params['enc_fwd']['whh'].astype(bf16),
        params['enc_bwd']['whh'].astype(bf16), H)

    # ---- Decoder init cell state (mirrors ATLASDecoder.forward) ----
    c_init = jnp.concatenate([cf, cb], axis=1)                            # (B,E)

    # ---- Attention: Wq/bq folded into the keys; Wo/bo folded into LSTM-0 ----
    att = params['attn']
    wq, bq, wk, bk = att['wq'], att['bq'], att['wk'], att['bk']
    wv, bv, wo, bo = att['wv'], att['bv'], att['wo'], att['bo']
    w_kq = wk @ wq.T                                                      # (E,E)
    b_kq = bk @ wq.T                                                      # (1,E)
    wsb = wk @ bq.T                                                       # (E,1)
    b_sb = (bk @ bq.T)[0, 0]                                              # scalar

    kq_flat, vp_flat, sb_flat = kvq_project(
        out_f.reshape(S * B, H), out_b.reshape(S * B, H),
        w_kq[:H].astype(bf16), w_kq[H:].astype(bf16), b_kq,
        wv[:H].astype(bf16), wv[H:].astype(bf16), bv,
        wsb[:H].T, wsb[H:].T)

    # TODO(synk): writing kq/vp batch-major straight from the projection kernel
    # would drop these two XLA transposes.
    kq_bse = jnp.transpose(kq_flat.reshape(S, B, E), (1, 0, 2))           # (B,S,E) bf16
    vp_bse = jnp.transpose(vp_flat.reshape(S, B, E), (1, 0, 2))           # (B,S,E) bf16
    sbias_bs = jnp.transpose(sb_flat.reshape(S, B), (1, 0)) + b_sb        # (B,S)

    scale = 1.0 / math.sqrt(float(E))
    score_add = (sbias_bs * scale
                 + jnp.where(encoder_masks == 0, jnp.float32(-1e9),
                             jnp.float32(0.0)))[:, None, :]               # (B,1,S)

    # ---- Decoder: hoisted x-gate projection + fused attention/2-layer LSTM ----
    wih0 = params['dec_l0']['wih']                                        # (E+D,4E)
    wih0_ctx, wih0_x = wih0[:E], wih0[E:]
    w_ctx = wo @ wih0_ctx                                                 # (E,4E)
    b0_eff = params['dec_l0']['b'] + bo @ wih0_ctx                        # (1,4E)

    dec_x = jnp.transpose(dec_emb, (1, 0, 2))                             # (T,B,D)
    gx0_flat = linear_tiled(dec_x.reshape(T * B, D), wih0_x.astype(bf16),
                            b0_eff, out_dtype=jnp.float32)
    gx0 = gx0_flat.reshape(T, B, 4 * E)

    dec_out_tbe = decoder_fused(
        gx0, kq_bse, vp_bse, score_add, c_init,
        w_ctx.astype(bf16), params['dec_l0']['whh'].astype(bf16),
        params['dec_l1']['wih'].astype(bf16), params['dec_l1']['whh'].astype(bf16),
        params['dec_l1']['b'])
    dec_out = jnp.transpose(dec_out_tbe, (1, 0, 2))                       # (B,T,E)

    # ---- Generator (CopyNet): hoisted projection + vocab-tiled logits/softmax ----
    # TODO(synk): CopyNet source is unavailable; approximated as bilinear copy
    # scoring logits[b,t,v] = (dec_out[b,t] @ W_copy) . vocab_emb[b,v].
    V = vocab.shape[1]
    Vp = max(128, ((V + 127) // 128) * 128)
    tile_v = next(tv for tv in (512, 256, 128) if Vp % tv == 0)
    pad = Vp - V

    vembT = jnp.transpose(vocab_emb, (0, 2, 1))                           # (B,D,V)
    vembT = jnp.pad(vembT, ((0, 0), (0, 0), (0, pad))).astype(bf16)       # (B,D,Vp)
    vmask_add = jnp.where(
        jnp.pad(vocab_mask.astype(jnp.int32), ((0, 0), (0, 0), (0, pad))) == 0,
        jnp.float32(-1e9), jnp.float32(0.0))                              # (B,1,Vp)

    proj_flat = linear_tiled(dec_out.reshape(B * T, E),
                             params['w_copy'].astype(bf16),
                             jnp.zeros((1, D), jnp.float32), out_dtype=bf16)
    proj = proj_flat.reshape(B, T, D)

    logits_p, m_bt1, l_bt1 = copynet_logits(proj, vembT, vmask_add, tile_v)
    probs_p = copynet_normalize(logits_p, m_bt1, l_bt1, tile_v)           # (B,T,Vp)
    probs = probs_p[:, :, :V]

    # ---- Training-style loss (eval-mode dropout, deterministic) ----
    gathered = jnp.take_along_axis(probs, targets[..., None], axis=-1)[..., 0]
    loss = -jnp.log(gathered)
    loss = jnp.where(decoder_masks == 0, 0.0, loss)
    res_true_len = jnp.sum(decoder_masks, axis=-1).astype(jnp.float32)
    totalloss = jnp.mean(loss, axis=-1) * assert_max_len / res_true_len
    return totalloss, probs


# --------------------------- parameter init ---------------------------

def init_params(key, vocab_size, emb_dim, hidden):
    # NOTE: single fused bias per gate block (PyTorch has b_ih + b_hh; equivalent
    # when parameters are initialized here rather than ported from a state_dict).
    E = 2 * hidden
    ks = jax.random.split(key, 16)

    def w(k, shape, scale=0.1):
        return (scale * jax.random.normal(k, shape)).astype(jnp.float32)

    def lstm_params(k, in_dim, hid):
        k1, k2, k3 = jax.random.split(k, 3)
        return {'wih': w(k1, (in_dim, 4 * hid)),
                'whh': w(k2, (hid, 4 * hid)),
                'b':   w(k3, (1, 4 * hid))}

    return {
        'embedding': w(ks[0], (vocab_size, emb_dim)),
        'enc_fwd': lstm_params(ks[1], emb_dim, hidden),
        'enc_bwd': lstm_params(ks[2], emb_dim, hidden),
        'attn': {'wq': w(ks[3], (E, E)), 'bq': w(ks[4], (1, E)),
                 'wk': w(ks[5], (E, E)), 'bk': w(ks[6], (1, E)),
                 'wv': w(ks[7], (E, E)), 'bv': w(ks[8], (1, E)),
                 'wo': w(ks[9], (E, E)), 'bo': w(ks[10], (1, E))},
        'dec_l0': lstm_params(ks[11], E + emb_dim, E),
        'dec_l1': lstm_params(ks[12], E, E),
        'w_copy': w(ks[13], (E, emb_dim)),
    }


# -------------------------------- main --------------------------------

if __name__ == "__main__":
    B, S, T, D, H, G, V = 2, 8, 4, 16, 16, 50, 10
    assert_max_len = T

    key = jax.random.PRNGKey(0)
    kparams, kdata = jax.random.split(key)
    params = init_params(kparams, G, D, H)

    kd = jax.random.split(kdata, 8)
    encoder_inputs = jax.random.randint(kd[0], (B, S), 0, G)
    encoder_masks = jnp.ones((B, S), jnp.int32).at[:, S - 2:].set(0)
    decoder_inputs = jax.random.randint(kd[1], (B, T), 0, G)
    decoder_masks = jnp.ones((B, T), jnp.int32).at[:, T - 1:].set(0)
    vocab = jax.random.randint(kd[2], (B, V), 0, G)
    vocab_mask = jnp.ones((B, 1, V), jnp.int32).at[:, :, V - 2:].set(0)
    antimasks = jnp.ones((B, T), jnp.int32)          # unused in forward (as in reference)
    targets = jax.random.randint(kd[3], (B, T), 0, V - 2)

    inputs = (encoder_inputs, encoder_masks, decoder_inputs, decoder_masks,
              vocab, vocab_mask, antimasks)

    totalloss, probs = atlas_forward(params, inputs, targets, assert_max_len)
    jax.block_until_ready((totalloss, probs))
    assert probs.shape == (B, T, V)
    assert totalloss.shape == (B,)
    print("KERNEL_OK")
</pallas_src>

<mosaic_0001>
module attributes {stable_mosaic.version = 11 : i64} {
  func.func @_enc_gates_kernel(%arg0: i32, %arg1: memref<16x16xf32, #tpu.memory_space<vmem>>, %arg2: memref<16x64xbf16, #tpu.memory_space<vmem>>, %arg3: memref<1x64xf32, #tpu.memory_space<vmem>>, %arg4: memref<16x64xbf16, #tpu.memory_space<vmem>>, %arg5: memref<1x64xf32, #tpu.memory_space<vmem>>, %arg6: memref<16x64xf32, #tpu.memory_space<vmem>>, %arg7: memref<16x64xf32, #tpu.memory_space<vmem>>) attributes {dimension_semantics = [#tpu.dimension_semantics<parallel>], iteration_bounds = array<i64: 1>, scalar_prefetch = 0 : i64, scratch_operands = 0 : i64, tpu.core_type = #tpu.core_type<tc>, window_params = [{transform_indices = @transform_0, window_bounds = array<i64: 16, 16>}, {pipeline_mode = #tpu.pipeline_mode<synchronous>, transform_indices = @transform_1, window_bounds = array<i64: 16, 64>}, {pipeline_mode = #tpu.pipeline_mode<synchronous>, transform_indices = @transform_2, window_bounds = array<i64: 1, 64>}, {pipeline_mode = #tpu.pipeline_mode<synchronous>, transform_indices = @transform_3, window_bounds = array<i64: 16, 64>}, {pipeline_mode = #tpu.pipeline_mode<synchronous>, transform_indices = @transform_4, window_bounds = array<i64: 1, 64>}, {transform_indices = @transform_5, window_bounds = array<i64: 16, 64>}, {transform_indices = @transform_6, window_bounds = array<i64: 16, 64>}]} {
    %c0 = arith.constant 0 : index
    %c0_0 = arith.constant 0 : index
    %0 = vector.load %arg1[%c0, %c0_0] : memref<16x16xf32, #tpu.memory_space<vmem>>, vector<16x16xf32>
    %1 = arith.truncf %0 : vector<16x16xf32> to vector<16x16xbf16>
    %c0_1 = arith.constant 0 : index
    %c0_2 = arith.constant 0 : index
    %2 = vector.load %arg2[%c0_1, %c0_2] : memref<16x64xbf16, #tpu.memory_space<vmem>>, vector<16x64xbf16>
    %cst = arith.constant dense<0.000000e+00> : vector<16x64xf32>
    %3 = tpu.matmul %1, %2, %cst {dimension_numbers = #tpu.dot_dimension_numbers<[1], [0], [0], [1], [0, 0, 1, 1], [], []>} : vector<16x16xbf16>, vector<16x64xbf16>, vector<16x64xf32> -> vector<16x64xf32>
    %c0_3 = arith.constant 0 : index
    %c0_4 = arith.constant 0 : index
    %4 = vector.load %arg3[%c0_3, %c0_4] : memref<1x64xf32, #tpu.memory_space<vmem>>, vector<1x64xf32>
    %5 = vector.broadcast %4 : vector<1x64xf32> to vector<16x64xf32>
    %6 = arith.addf %3, %5 : vector<16x64xf32>
    %c0_5 = arith.constant 0 : index
    %c0_6 = arith.constant 0 : index
    %7 = vector.load %arg6[%c0_5, %c0_6] : memref<16x64xf32, #tpu.memory_space<vmem>>, vector<16x64xf32>
    tpu.vector_store %arg6[%c0_5, %c0_6], %6 {strides = array<i32>} : memref<16x64xf32, #tpu.memory_space<vmem>>, vector<16x64xf32>,
    %c0_7 = arith.constant 0 : index
    %c0_8 = arith.constant 0 : index
    %8 = vector.load %arg4[%c0_7, %c0_8] : memref<16x64xbf16, #tpu.memory_space<vmem>>, vector<16x64xbf16>
    %cst_9 = arith.constant dense<0.000000e+00> : vector<16x64xf32>
    %9 = tpu.matmul %1, %8, %cst_9 {dimension_numbers = #tpu.dot_dimension_numbers<[1], [0], [0], [1], [0, 0, 1, 1], [], []>} : vector<16x16xbf16>, vector<16x64xbf16>, vector<16x64xf32> -> vector<16x64xf32>
    %c0_10 = arith.constant 0 : index
    %c0_11 = arith.constant 0 : index
    %10 = vector.load %arg5[%c0_10, %c0_11] : memref<1x64xf32, #tpu.memory_space<vmem>>, vector<1x64xf32>
    %11 = vector.broadcast %10 : vector<1x64xf32> to vector<16x64xf32>
    %12 = arith.addf %9, %11 : vector<16x64xf32>
    %c0_12 = arith.constant 0 : index
    %c0_13 = arith.constant 0 : index
    %13 = vector.load %arg7[%c0_12, %c0_13] : memref<16x64xf32, #tpu.memory_space<vmem>>, vector<16x64xf32>
    tpu.vector_store %arg7[%c0_12, %c0_13], %12 {strides = array<i32>} : memref<16x64xf32, #tpu.memory_space<vmem>>, vector<16x64xf32>,
    return
  }
  func.func @transform_0(%arg0: i32) -> (i32, i32) {
    %c0_i32 = arith.constant 0 : i32
    %c0_i32_0 = arith.constant 0 : i32
    return %arg0, %c0_i32 : i32, i32
  }
  func.func @transform_1(%arg0: i32) -> (i32, i32) {
    %c0_i32 = arith.constant 0 : i32
    %c0_i32_0 = arith.constant 0 : i32
    %c0_i32_1 = arith.constant 0 : i32
    return %c0_i32, %c0_i32_0 : i32, i32
  }
  func.func @transform_2(%arg0: i32) -> (i32, i32) {
    %c0_i32 = arith.constant 0 : i32
    %c0_i32_0 = arith.constant 0 : i32
    %c0_i32_1 = arith.constant 0 : i32
    return %c0_i32, %c0_i32_0 : i32, i32
  }
  func.func @transform_3(%arg0: i32) -> (i32, i32) {
    %c0_i32 = arith.constant 0 : i32
    %c0_i32_0 = arith.constant 0 : i32
    %c0_i32_1 = arith.constant 0 : i32
    return %c0_i32, %c0_i32_0 : i32, i32
  }
  func.func @transform_4(%arg0: i32) -> (i32, i32) {
    %c0_i32 = arith.constant 0 : i32
    %c0_i32_0 = arith.constant 0 : i32
    %c0_i32_1 = arith.constant 0 : i32
    return %c0_i32, %c0_i32_0 : i32, i32
  }
  func.func @transform_5(%arg0: i32) -> (i32, i32) {
    %c0_i32 = arith.constant 0 : i32
    %c0_i32_0 = arith.constant 0 : i32
    return %arg0, %c0_i32 : i32, i32
  }
  func.func @transform_6(%arg0: i32) -> (i32, i32) {
    %c0_i32 = arith.constant 0 : i32
    %c0_i32_0 = arith.constant 0 : i32
    return %arg0, %c0_i32 : i32, i32
  }
}

</mosaic_0001>

<bundles_post_ra>
// kernel: tpu_custom_call.1
= control target key start
LH: loop header
LB: loop body
LE: loop exit
PB: predicated region body
PF: predicated region fallthrough
CT: control target
= control target key end

     0   :  { %12 = vsyncpa [#allocation3], 0  ;;  %s403_s0 = inlined_call_operand.hbm [shape: f32[16,16], index: 0, kind: input, shape index: {}]   ;;  %s404_s1 = inlined_call_operand.hbm [shape: bf16[16,64], index: 1, kind: input, shape index: {}]   ;;  %s405_s2 = inlined_call_operand.vmem [shape: f32[1,64], index: 2, kind: input, shape index: {}]   ;;  %s406_s3 = inlined_call_operand.hbm [shape: bf16[16,64], index: 3, kind: input, shape index: {}]   ;;  %s407_s4 = inlined_call_operand.vmem [shape: f32[1,64], index: 4, kind: input, shape index: {}]   ;;  %s408_s5 = inlined_call_operand.hbm [shape: f32[16,64], index: 5, kind: output, shape index: {0}]   ;;  %s409_s6 = inlined_call_operand.hbm [shape: f32[16,64], index: 6, kind: output, shape index: {1}]  }
   0x1   :  { %13 = vsyncpa [#allocation6], 0 }
   0x2   :  { %14 = vsyncpa [#allocation4], 0  ;;  %s33_s23 = sshll.u32 %s404_s1, 4  ;;  %s34_s23 = int_to_ptr.hbm [resolvable:$true] %s33_s23 }
   0x3   :  { %15 = vsyncpa [#allocation10], 0  ;;  %s325_s24 = smov [#allocation5]   ;;  %s20_s28 = sshll.u32 %s403_s0, 4  ;;  %s21_s28 = int_to_ptr.hbm [resolvable:$true] %s20_s28 }
   0x4   :  { %s35_s25 = sshll.u32 %s325_s24, 4  ;;  %s326_s29 = smov 64   ;;  %s36_s25 = int_to_ptr.vmem [resolvable:$true] %s35_s25 }
   0x5   :  { %s327_s30 = smov 4   ;;  %s328_s7 = smov [#allocation2]  }
   0x6   :  { %41 = dma.hbm_to_vmem [thread:$0]  %s34_s23, 128, %s36_s25, [#allocation6], %s326_s29, %s326_s29, %s327_s30  }
   0x7   :  { %s22_s8 = sshll.u32 %s328_s7, 4  ;;  %s329_s9 = smov 128   ;;  %s23_s8 = int_to_ptr.vmem [resolvable:$true] %s22_s8 }
   0x8   :  { %s330_s10 = smov 8   ;;  %s48_s12 = sshll.u32 %s406_s3, 4  ;;  %s49_s12 = int_to_ptr.hbm [resolvable:$true] %s48_s12 }
   0x9   :  { %28 = dma.hbm_to_vmem [thread:$0]  %s21_s28, 256, %s23_s8, [#allocation3], %s329_s9, %s329_s9, %s330_s10  }
   0xa   :  { %s331_s13 = smov [#allocation7]  }
   0xb   :  { %s50_s0 = sshll.u32 %s331_s13, 4  ;;  %s51_s0 = int_to_ptr.vmem [resolvable:$true] %s50_s0 }
   0xc   :  { %56 = dma.hbm_to_vmem [thread:$0]  %s49_s12, 128, %s51_s0, [#allocation6], %s326_s29, %s326_s29, %s327_s30  }
   0xd   :  { %317 = dma.done.wait [#allocation3], 256  }
   0xe   :  { %318 = vsyncadd [#allocation3], 4294967040 }
   0xf   :  { %319 = dma.done.wait [#allocation6], 256  }
  0x10   :  { %320 = vsyncadd [#allocation6], 4294967040  ;;  %v184_v0 = vld [vmem:[#allocation5] sm:$0xff]  ;;  %v185_v1 = vld [vmem:[#allocation7] sm:$0xff]  ;;  %vm87_vm0 = vcmask 130048   ;;  %vm105_vm1 = vcmask 523264  }
  0x11   :  { %v72_v2 = vld [vmem:[#allocation2] sm:$0xff]  ;;  %v73_v3 = vld [vmem:[#allocation2 + $0x8] sm:$0xff]  ;;  %98 = vmatpush.bf16.msra.mxu0 %v184_v0  ;;  %127 = vmatpush.bf16.msra.mxu1 %v185_v1  ;;  %s332_s17 = smov [#allocation8]   ;;  %s142_s21 = sshll.u32 %s408_s5, 4  ;;  %s143_s21 = int_to_ptr.hbm [resolvable:$true] %s142_s21 }
  0x12   :  { %v74_v4 = vpack.c.bf16 %v73_v3, %v72_v2  ;;  %v195_v5 = vld [vmem:[%s405_s2] ss:$0 sm:$0xff]  ;;  %s140_s18 = sshll.u32 %s332_s17, 4  ;;  %s333_s2 = smov [#allocation9]   ;;  %s141_s18 = int_to_ptr.vmem [resolvable:$true] %s140_s18 }
  0x13   :  { %v196_v6 = vld [vmem:[%s407_s4] ss:$0 sm:$0xff]  ;;  %s153_s22 = sshll.u32 %s333_s2, 4  ;;  %s155_s4 = sshll.u32 %s409_s6, 4  ;;  %s154_s22 = int_to_ptr.vmem [resolvable:$true] %s153_s22  ;;  %s156_s4 = int_to_ptr.hbm [resolvable:$true] %s155_s4 }
  0x14   :  { %178 = vmatmul.msk.bf16.vlgmr.msra.gmra.mxu0 %vm87_vm0, %v74_v4  ;;  %183 = vmatmul.msk.bf16.vlgmr.msra.gmra.mxu1 %vm87_vm0, %v74_v4 }
  0x91   :  { %v100_v7 = vpop.f32.mrf.mxu0  ;;  %v129_v8 = vpop.f32.mrf.mxu1 }
  0x92   :  { %v101_v9 = vadd.f32 %v195_v5, %v100_v7  ;;  %v130_v10 = vadd.f32 %v196_v6, %v129_v8 }
  0x94   :  { %106 = vst.msk [vmem:[#allocation8] sm:$0xff] %vm105_vm1, %v101_v9 }
  0x95   :  { %134 = vst.msk [vmem:[#allocation9] sm:$0xff] %vm105_vm1, %v130_v10 }
  0x99   :  { %v102_v11 = vpop.f32.mrf.mxu0  ;;  %v131_v12 = vpop.f32.mrf.mxu1 }
  0x9a   :  { %v103_v13 = vadd.f32 %v195_v5, %v102_v11  ;;  %v132_v14 = vadd.f32 %v196_v6, %v131_v12 }
  0x9c   :  { %107 = vst.msk [vmem:[#allocation8 + $0x8] sm:$0xff] %vm105_vm1, %v103_v13 }
  0x9d   :  { %135 = vst.msk [vmem:[#allocation9 + $0x8] sm:$0xff] %vm105_vm1, %v132_v14  ;;  %148 = dma.vmem_to_hbm [thread:$0]  %s141_s18, 256, %s143_s21, [#allocation4], %s329_s9, %s329_s9, %s330_s10  }
  0x9e   :  { %161 = dma.vmem_to_hbm [thread:$0]  %s154_s22, 256, %s156_s4, [#allocation10], %s329_s9, %s329_s9, %s330_s10  }
  0x9f   :  { %321 = dma.done.wait [#allocation4], 256  }
  0xa0   :  { %322 = vsyncadd [#allocation4], 4294967040 }
  0xa1   :  { %323 = dma.done.wait [#allocation10], 256  }
  0xa2   :  { %324 = vsyncadd [#allocation10], 4294967040 }
  0xa3   :  { %170 = vsyncpa [#allocation3], 1 }
  0xa4   :  { %171 = vsyncpa [#allocation6], 1 }
  0xa5   :  { %172 = vsyncpa [#allocation4], 1 }
  0xa6   :  { %173 = vsyncpa [#allocation10], 1 }

</bundles_post_ra>
